<compile_context>
chip_gen: v7x
topology: tpu7x:2x2x1
jax: 0.10.0
libtpu: 0.0.40
codegen_flags: <defaults>
</compile_context>

<pallas_src>
import math

import numpy as np
import jax
import jax.numpy as jnp
from jax.experimental import pallas as pl
from jax.experimental.pallas import tpu as pltpu


def _round_up(a, b):
    return (a + b - 1) // b * b


# ---------------------------------------------------------------------------
# Kernel bodies
# ---------------------------------------------------------------------------
def _conv1d_matmul_kernel(x_ref, w_ref, b_ref, o_ref):
    """Full reduction depth in one MXU matmul + f32 bias add."""
    # x_ref: (TL, KC)  w_ref: (KC, TCO)  b_ref: (1, TCO) f32  o_ref: (TL, TCO)
    acc = jnp.dot(x_ref[...], w_ref[...], preferred_element_type=jnp.float32)
    o_ref[...] = (acc + b_ref[...]).astype(o_ref.dtype)


def _conv1d_matmul_acc_kernel(x_ref, w_ref, b_ref, o_ref, acc_ref):
    """KC split over the innermost ('arbitrary') grid axis, f32 accumulator."""
    k = pl.program_id(2)

    @pl.when(k == 0)
    def _():
        acc_ref[...] = jnp.zeros_like(acc_ref)

    acc_ref[...] += jnp.dot(x_ref[...], w_ref[...],
                            preferred_element_type=jnp.float32)

    @pl.when(k == pl.num_programs(2) - 1)
    def _():
        o_ref[...] = (acc_ref[...] + b_ref[...]).astype(o_ref.dtype)


# ---------------------------------------------------------------------------
# Tiling plan
# ---------------------------------------------------------------------------
def _vmem_budget_bytes():
    """~75% of per-core VMEM (v5e/v6e: 96 MiB, v7x: 48 MiB); safe fallback."""
    try:
        cap = int(pltpu.get_tpu_info().vmem_capacity_bytes)
        budget = cap * 3 // 4
    except Exception:
        budget = 48 * 1024 * 1024
    return max(32 * 1024 * 1024, min(budget, 96 * 1024 * 1024))


def _plan_tiles(R, KC, C_out, in_itemsize, out_itemsize, budget):
    """Pick (TL, TKC, TCO) + padded extents so double-buffered tiles fit."""
    KC_pad = _round_up(KC, 128)
    C_out_128 = _round_up(C_out, 128)

    # ---- C_out tile: no TCO=128 cliff for awkward widths; 1024-wide tiles when
    #      VMEM is plentiful (v5e/v6e) to push arithmetic intensity past the knee.
    cap_tco = 1024 if budget >= 80 * (1 << 20) else 512
    if C_out_128 <= cap_tco:
        TCO = C_out_128
    else:
        best = None
        for cand in range(cap_tco, 255, -128):
            key = ((-C_out_128) % cand, -cand)          # min padding, then widest
            if best is None or key < best[0]:
                best = (key, cand)
        TCO = best[1]

    def fits(tl, tkc, tco, split):
        fb = 2 * (tl * tkc + tkc * tco) * in_itemsize   # x + w, double buffered
        fb += 2 * tl * tco * out_itemsize               # out, double buffered
        fb += 2 * tco * 4                               # f32 bias
        if split:
            fb += tl * tco * 4                          # f32 accumulator scratch
        return fb <= budget * 0.9

    # ---- row tile: batch folded into rows -> aim for big sublane-aligned M.
    R8 = _round_up(max(R, 1), 8)
    if R8 <= 1024:
        TL = R8
    else:
        best = None
        for cand in (1024, 896, 768, 640, 512, 384, 256):
            key = (_round_up(R8, cand), -cand)          # min padded rows, widest
            if best is None or key < best[0]:
                best = (key, cand)
        TL = best[1]

    TKC = KC_pad
    while not fits(TL, TKC, TCO, False) and TL > 64:
        TL = _round_up(max(TL // 2, 64), 8)

    if not fits(TL, TKC, TCO, False):
        # KC-reduction fallback (v7x 64 MiB VMEM / very deep K*C_in).
        while TKC > 128 and not fits(TL, TKC, TCO, True):
            TKC = _round_up(max(TKC // 2, 128), 128)
        while not fits(TL, TKC, TCO, True) and TCO > 128:   # last resort
            TCO -= 128

    KC_pad = _round_up(KC_pad, TKC)
    C_out_pad = _round_up(C_out_128, TCO)
    num_k = KC_pad // TKC
    num_co = C_out_pad // TCO

    R_pad = _round_up(max(R, 1), TL)
    num_rt = R_pad // TL
    # v7x megacore: guarantee >= 2 parallel tiles when the problem allows it.
    if num_rt * num_co == 1 and R8 >= 16:
        TL = _round_up((R8 + 1) // 2, 8)
        R_pad = _round_up(max(R, 1), TL)
        num_rt = R_pad // TL

    return TL, TKC, TCO, R_pad, KC_pad, C_out_pad, num_rt, num_co, num_k


# ---------------------------------------------------------------------------
# Public entry points
# ---------------------------------------------------------------------------
def conv1d_pallas_nlc(x_nlc, weight, bias, *, stride=1, padding=0, dilation=1,
                      compute_dtype=jnp.bfloat16, max_vmem_bytes=None):
    """Conv1d forward on channels-last input.

    x_nlc:  (N, L, C_in)
    weight: (C_out, C_in, K)   (torch Conv1d layout)
    bias:   (C_out,) or None
    returns (N, L_out, C_out)

    `max_vmem_bytes` overrides the tile-sizing VMEM budget (testing / tuning).
    NOTE: under jit the weight/bias repacking below is constant-folded; callers
    on a hot path can hoist it by packing weights once themselves.
    """
    N, L, C_in = x_nlc.shape
    C_out, C_in_w, K = weight.shape
    assert C_in_w == C_in, "weight / input channel mismatch"
    L_out = (L + 2 * padding - dilation * (K - 1) - 1) // stride + 1
    assert L_out > 0, "output length must be positive"
    if bias is None:
        bias = jnp.zeros((C_out,), jnp.float32)

    compute_dtype = np.dtype(compute_dtype)
    out_dtype = np.dtype(x_nlc.dtype)
    KC = K * C_in
    R = N * L_out                                   # batch folded into rows

    chip_budget = _vmem_budget_bytes()
    tile_budget = chip_budget if max_vmem_bytes is None else int(max_vmem_bytes)

    (TL, TKC, TCO, R_pad, KC_pad, C_out_pad,
     num_rt, num_co, num_k) = _plan_tiles(
        R, KC, C_out, compute_dtype.itemsize, out_dtype.itemsize, tile_budget)

    # ---- wrapper-side layout: cast EARLY (im2col buffer is built in the compute
    #      dtype), im2col the K taps on the raw channel axis, fold batch into
    #      rows, then pad the fused K*C_in axis once.
    x_c = x_nlc.astype(compute_dtype)
    x_p = jnp.pad(x_c, ((0, 0), (padding, padding), (0, 0)))
    span = (L_out - 1) * stride + 1
    taps = []
    for k in range(K):
        s = k * dilation
        tap = jax.lax.slice_in_dim(x_p, s, s + span, axis=1)
        if stride > 1:
            tap = tap[:, ::stride, :]               # stride folded in the wrapper
        taps.append(tap)
    x_col = jnp.concatenate(taps, axis=-1).reshape(R, KC)      # (N*L_out, K*C_in)
    x_col = jnp.pad(x_col, ((0, R_pad - R), (0, KC_pad - KC)))

    # Weights: (C_out, C_in, K) -> (K, C_in, C_out) -> (K*C_in, C_out); the row
    # order (k major, c_in minor) matches the tap concatenation above.
    w_col = jnp.transpose(weight, (2, 1, 0)).reshape(KC, C_out).astype(compute_dtype)
    w_col = jnp.pad(w_col, ((0, KC_pad - KC), (0, C_out_pad - C_out)))
    b_p = jnp.pad(bias.astype(jnp.float32),
                  (0, C_out_pad - C_out)).reshape(1, C_out_pad)

    # 3-deep pipelining on the streamed x tiles when per-step MXU work is small.
    grid_steps = num_rt * num_co * num_k
    want_deep = (2 * TL * TKC * TCO < 64 * 1024 * 1024) and grid_steps >= 3

    def _x_spec(shape, index_map, deep):
        if deep:
            try:
                return pl.BlockSpec(shape, index_map, pipeline_mode=pl.Buffered(3))
            except (TypeError, AttributeError):
                return pl.BlockSpec(shape, index_map)
        return pl.BlockSpec(shape, index_map)

    def _run(deep):
        if num_k == 1:
            # co innermost: the big x tile stays VMEM-resident while the small
            # weight tile streams (x is read from HBM exactly once).
            grid = (num_rt, num_co)
            in_specs = [
                _x_spec((TL, KC_pad), lambda rt, co: (rt, 0), deep),
                pl.BlockSpec((KC_pad, TCO), lambda rt, co: (0, co)),
                pl.BlockSpec((1, TCO), lambda rt, co: (0, co)),
            ]
            out_specs = pl.BlockSpec((TL, TCO), lambda rt, co: (rt, co))
            scratch = []
            sem = ("parallel", "parallel")
            kernel = _conv1d_matmul_kernel
        else:
            # KC-reduction fallback: k innermost, f32 accumulator in VMEM.
            grid = (num_rt, num_co, num_k)
            in_specs = [
                _x_spec((TL, TKC), lambda rt, co, k: (rt, k), deep),
                pl.BlockSpec((TKC, TCO), lambda rt, co, k: (k, co)),
                pl.BlockSpec((1, TCO), lambda rt, co, k: (0, co)),
            ]
            out_specs = pl.BlockSpec((TL, TCO), lambda rt, co, k: (rt, co))
            scratch = [pltpu.VMEM((TL, TCO), jnp.float32)]
            sem = ("parallel", "parallel", "arbitrary")
            kernel = _conv1d_matmul_acc_kernel

        return pl.pallas_call(
            kernel,
            out_shape=jax.ShapeDtypeStruct((R_pad, C_out_pad), out_dtype),
            grid_spec=pltpu.PrefetchScalarGridSpec(
                num_scalar_prefetch=0,
                grid=grid,
                in_specs=in_specs,
                out_specs=out_specs,
                scratch_shapes=scratch,
            ),
            compiler_params=pltpu.CompilerParams(
                dimension_semantics=sem,
                vmem_limit_bytes=chip_budget,
            ),
        )(x_col, w_col, b_p)

    if want_deep:
        try:
            out = _run(True)
        except Exception:            # pipeline_mode unsupported on this build
            out = _run(False)
    else:
        out = _run(False)

    # Strip row / channel padding (padded rows/cols hold bias-only garbage).
    return out[:R, :C_out].reshape(N, L_out, C_out)


def conv1d_pallas(x_ncl, weight, bias, *, stride=1, padding=0, dilation=1,
                  compute_dtype=jnp.bfloat16, max_vmem_bytes=None):
    """Drop-in torch.nn.Conv1d layout: x (N, C_in, L) -> (N, C_out, L_out).

    Prefer conv1d_pallas_nlc with a channels-last model end-to-end; this wrapper
    adds two full-tensor HBM transposes purely for layout parity.
    """
    out_nlc = conv1d_pallas_nlc(
        jnp.transpose(x_ncl, (0, 2, 1)), weight, bias,
        stride=stride, padding=padding, dilation=dilation,
        compute_dtype=compute_dtype, max_vmem_bytes=max_vmem_bytes)
    return jnp.transpose(out_nlc, (0, 2, 1))


def init_conv1d_params(key, in_channels, out_channels, kernel_size, w_init="linear"):
    """Matches the PyTorch module init:
       weight: xavier_uniform_ with gain=calculate_gain('linear')=1.0
       bias:   nn.Conv1d default uniform(-1/sqrt(fan_in), 1/sqrt(fan_in))."""
    k_w, k_b = jax.random.split(key)
    gain = 1.0  # calculate_gain('linear')
    fan_in = in_channels * kernel_size
    fan_out = out_channels * kernel_size
    bound_w = gain * math.sqrt(6.0 / (fan_in + fan_out))
    weight = jax.random.uniform(
        k_w, (out_channels, in_channels, kernel_size),
        minval=-bound_w, maxval=bound_w, dtype=jnp.float32)
    bound_b = 1.0 / math.sqrt(fan_in)
    bias = jax.random.uniform(
        k_b, (out_channels,), minval=-bound_b, maxval=bound_b, dtype=jnp.float32)
    return weight, bias


if __name__ == "__main__":
    key = jax.random.PRNGKey(0)

    def ref_conv(x, w, b, stride, padding, dilation):
        return jax.lax.conv_general_dilated(
            x, w, window_strides=(stride,), padding=[(padding, padding)],
            rhs_dilation=(dilation,),
            dimension_numbers=("NCH", "OIH", "NCH"),
            precision=jax.lax.Precision.HIGHEST) + b[None, :, None]

    # Case 1: small shapes consistent with the module (same-padding K=3 conv).
    N, C_in, C_out, L = 2, 4, 8, 16
    K, stride, padding, dilation = 3, 1, 1, 1
    k_x, k_p, key = jax.random.split(key, 3)
    x = jax.random.normal(k_x, (N, C_in, L), dtype=jnp.float32)
    w, b = init_conv1d_params(k_p, C_in, C_out, K, w_init="linear")
    ref = ref_conv(x, w, b, stride, padding, dilation)

    out_f32 = conv1d_pallas(x, w, b, stride=stride, padding=padding,
                            dilation=dilation, compute_dtype=jnp.float32)
    out_f32 = jax.block_until_ready(out_f32)
    assert out_f32.shape == (N, C_out, L)
    assert jnp.max(jnp.abs(out_f32 - ref)) < 1e-4

    out_bf16 = conv1d_pallas(x, w, b, stride=stride, padding=padding,
                             dilation=dilation, compute_dtype=jnp.bfloat16)
    out_bf16 = jax.block_until_ready(out_bf16)
    assert jnp.max(jnp.abs(out_bf16 - ref)) < 1e-1   # bf16 operands, f32 accumulate

    # Case 2: stride / dilation / odd length / channel counts not multiple of 128.
    N2, C_in2, C_out2, L2 = 2, 4, 5, 17
    K2, stride2, padding2, dilation2 = 3, 2, 2, 2
    k_x2, k_p2, key = jax.random.split(key, 3)
    x2 = jax.random.normal(k_x2, (N2, C_in2, L2), dtype=jnp.float32)
    w2, b2 = init_conv1d_params(k_p2, C_in2, C_out2, K2, w_init="linear")
    out2 = conv1d_pallas(x2, w2, b2, stride=stride2, padding=padding2,
                         dilation=dilation2, compute_dtype=jnp.float32)
    out2 = jax.block_until_ready(out2)
    ref2 = ref_conv(x2, w2, b2, stride2, padding2, dilation2)
    L_out2 = (L2 + 2 * padding2 - dilation2 * (K2 - 1) - 1) // stride2 + 1
    assert out2.shape == (N2, C_out2, L_out2)
    assert jnp.max(jnp.abs(out2 - ref2)) < 1e-4

    # Case 3: force a tiny tile budget to exercise the KC-reduction (accumulator)
    # path and deep (3-buffer) pipelining. Tolerance is loose only to be robust
    # to the TPU's f32 matmul mode; an indexing/accumulation bug would be O(1).
    N3, C_in3, C_out3, L3 = 2, 256, 300, 64
    K3 = 3
    k_x3, k_p3, key = jax.random.split(key, 3)
    x3 = jax.random.normal(k_x3, (N3, C_in3, L3), dtype=jnp.float32)
    w3, b3 = init_conv1d_params(k_p3, C_in3, C_out3, K3, w_init="linear")
    out3 = conv1d_pallas(x3, w3, b3, stride=1, padding=1, dilation=1,
                         compute_dtype=jnp.float32, max_vmem_bytes=1 << 20)
    out3 = jax.block_until_ready(out3)
    ref3 = ref_conv(x3, w3, b3, 1, 1, 1)
    assert out3.shape == (N3, C_out3, L3)
    assert jnp.max(jnp.abs(out3 - ref3)) < 5e-2

    print("KERNEL_OK")
</pallas_src>

<mosaic_0001>
module attributes {stable_mosaic.version = 11 : i64} {
  func.func @_conv1d_matmul_kernel(%arg0: i32, %arg1: i32, %arg2: memref<16x128xf32, #tpu.memory_space<vmem>>, %arg3: memref<128x128xf32, #tpu.memory_space<vmem>>, %arg4: memref<1x128xf32, #tpu.memory_space<vmem>>, %arg5: memref<16x128xf32, #tpu.memory_space<vmem>>) attributes {dimension_semantics = [#tpu.dimension_semantics<parallel>, #tpu.dimension_semantics<parallel>], iteration_bounds = array<i64: 2, 1>, scalar_prefetch = 0 : i64, scratch_operands = 0 : i64, tpu.core_type = #tpu.core_type<tc>, window_params = [{transform_indices = @transform_0, window_bounds = array<i64: 16, 128>}, {transform_indices = @transform_1, window_bounds = array<i64: 128, 128>}, {transform_indices = @transform_2, window_bounds = array<i64: 1, 128>}, {transform_indices = @transform_3, window_bounds = array<i64: 16, 128>}]} {
    %c0 = arith.constant 0 : index
    %c0_0 = arith.constant 0 : index
    %0 = vector.load %arg2[%c0, %c0_0] : memref<16x128xf32, #tpu.memory_space<vmem>>, vector<16x128xf32>
    %c0_1 = arith.constant 0 : index
    %c0_2 = arith.constant 0 : index
    %1 = vector.load %arg3[%c0_1, %c0_2] : memref<128x128xf32, #tpu.memory_space<vmem>>, vector<128x128xf32>
    %cst = arith.constant dense<0.000000e+00> : vector<16x128xf32>
    %2 = tpu.matmul %0, %1, %cst {dimension_numbers = #tpu.dot_dimension_numbers<[1], [0], [0], [1], [0, 0, 1, 1], [], []>} : vector<16x128xf32>, vector<128x128xf32>, vector<16x128xf32> -> vector<16x128xf32>
    %c0_3 = arith.constant 0 : index
    %c0_4 = arith.constant 0 : index
    %3 = vector.load %arg4[%c0_3, %c0_4] : memref<1x128xf32, #tpu.memory_space<vmem>>, vector<1x128xf32>
    %4 = vector.broadcast %3 : vector<1x128xf32> to vector<16x128xf32>
    %5 = arith.addf %2, %4 : vector<16x128xf32>
    %c0_5 = arith.constant 0 : index
    %c0_6 = arith.constant 0 : index
    %6 = vector.load %arg5[%c0_5, %c0_6] : memref<16x128xf32, #tpu.memory_space<vmem>>, vector<16x128xf32>
    tpu.vector_store %arg5[%c0_5, %c0_6], %5 {strides = array<i32>} : memref<16x128xf32, #tpu.memory_space<vmem>>, vector<16x128xf32>,
    return
  }
  func.func @transform_0(%arg0: i32, %arg1: i32) -> (i32, i32) {
    %c0_i32 = arith.constant 0 : i32
    %c0_i32_0 = arith.constant 0 : i32
    return %arg0, %c0_i32 : i32, i32
  }
  func.func @transform_1(%arg0: i32, %arg1: i32) -> (i32, i32) {
    %c0_i32 = arith.constant 0 : i32
    %c0_i32_0 = arith.constant 0 : i32
    return %c0_i32, %arg1 : i32, i32
  }
  func.func @transform_2(%arg0: i32, %arg1: i32) -> (i32, i32) {
    %c0_i32 = arith.constant 0 : i32
    %c0_i32_0 = arith.constant 0 : i32
    return %c0_i32, %arg1 : i32, i32
  }
  func.func @transform_3(%arg0: i32, %arg1: i32) -> (i32, i32) {
    %c0_i32 = arith.constant 0 : i32
    return %arg0, %arg1 : i32, i32
  }
}

</mosaic_0001>

<bundles_post_ra>
// kernel: tpu_custom_call.1
= control target key start
LH: loop header
LB: loop body
LE: loop exit
PB: predicated region body
PF: predicated region fallthrough
CT: control target
= control target key end

     0   :  { %8 = vsyncpa [#allocation3], 0  ;;  %s1057_s0 = inlined_call_operand.hbm [shape: f32[32,128], index: 0, kind: input, shape index: {}]   ;;  %s1058_s1 = inlined_call_operand.hbm [shape: f32[128,128], index: 1, kind: input, shape index: {}]   ;;  %s1059_s2 = inlined_call_operand.vmem [shape: f32[1,128], index: 2, kind: input, shape index: {}]   ;;  %s1060_s3 = inlined_call_operand.hbm [shape: f32[32,128], index: 3, kind: output, shape index: {}]  }
   0x1   :  { %10 = vsyncpa [#allocation3 + $0x1], 0 }
   0x2   :  { %11 = vsyncpa [#allocation6], 0 }
   0x3   :  { %12 = vsyncpa [#allocation4], 0 }
   0x4   :  { %14 = vsyncpa [#allocation4 + $0x1], 0  ;;  %s821_s12 = smov 0   ;;  %s823_s13 = smov 0  }
   0x5   :  { %s825_s14 = smov 0   ;;  %s827_s15 = smov 0  }
   0x6   :  { %s829_s16 = smov 0   ;;  %s831_s17 = smov 0  }
   0x7 LB: > { %s465_s18 = sadd.s32 4294967295, %s792_s17   ;;  %s466_s19 = sadd.s32 4294967294, %s792_s17   ;;  %s792_s17 = sphi %s831_s17, %s20_s17   ;;  %s788_s16 = sphi %s829_s16, %s1084_s16   ;;  %s784_s15 = sphi %s827_s15, %s1083_s15   ;;  %s780_s14 = sphi %s825_s14, %s1082_s14   ;;  %s776_s13 = sphi %s823_s13, %s1081_s13   ;;  %s772_s12 = sphi %s821_s12, %s1080_s12  }
   0x8   : > { %p52_p0 = scmp.ne.s32.totalorder %s776_s13, %s772_s12  ;;  %p855_p1 = scmp.eq.s32.totalorder %s465_s18, 0 }
   0x9   : > { %p859_p2 = scmp.eq.s32.totalorder %s465_s18, 1  ;;  %p136_p3 = scmp.eq.s32.totalorder %s466_s19, 1 }
   0xa   : > { %s1065_s20 = scalar_select %p855_p1, 1, 0 }
   0xb   : > { %s1066_s21 = scalar_select %p859_p2, 1, 0 }
   0xc   : > { %p865_p4 = por %p855_p1, %p52_p0  ;;  %p467_p5 = scmp.ge.s32.totalorder %s792_s17, 1 }
   0xd   : > { %p870_p6 = por %p136_p3, %p52_p0  ;;  %p143_p7 = scmp.lt.s32.totalorder %s792_s17, 3 }
   0xe   : > { %s1067_s22 = scalar_select %p865_p4, 1, 0 }
   0xf   : > { %s1068_s23 = scalar_select %p870_p6, 1, 0 }
  0x10   : > { %p875_p8 = pnand %p467_p5, %p143_p7  ;;  %s794_s25 = smov [#allocation5]  }
  0x11   : > { %s157_s26 = sshll.u32 %s794_s25, 4  ;;  %s32_s28 = sadd.s32 1, %s788_s16  ;;  %s158_s26 = int_to_ptr.vmem [resolvable:$true] %s157_s26 }
  0x12   : > { %s1069_s24 = scalar_select %p875_p8, 1, 0 }
  0x13   : > { %p579_p9 = pneg %p875_p8  ;;  %s648_s4 = scalar_lea.hbm %s1058_s1, 2048 }
  0x14   : > { %p649_p12 = scmp.ne.s32.totalorder %s1058_s1, %s648_s4  ;;  %p655_p5 = scmp.lt.u32.totalorder %s648_s4, %s1058_s1 }
  0x15   : > { %p884_p11 = pnand %p579_p9, %p855_p1 }
  0x17   : > { %p650_p13 = pneg %p884_p11 }
  0x19   : > { %p651_p0 = pnand %p650_p13, %p649_p12 }
  0x1b   : > { %p652_p3 = pneg %p651_p0 }
  0x1d   : > { %p657_p7 = pnand %p655_p5, %p652_p3 }
  0x1f   : > { %660 = shalt.err (!%p657_p7)
}
  0x20   : > { %s661_s9 = scalar_lea.vmem %s158_s26, 2048  ;;  %p669_p1 = scmp.lt.s32.totalorder %s158_s26, %s158_s26 }
  0x21   : > { %p662_p9 = scmp.ne.s32.totalorder %s158_s26, %s661_s9  ;;  %p670_p4 = scmp.lt.s32.totalorder %s661_s9, %s661_s9 }
  0x23   : > { %p664_p10 = pnand %p662_p9, %p650_p13  ;;  %p671_p8 = por %p670_p4, %p669_p1 }
  0x25   : > { %p665_p6 = pneg %p664_p10 }
  0x27   : > { %p672_p2 = pnand %p671_p8, %p665_p6 }
  0x29   : > { %675 = shalt.err (!%p672_p2)
}
  0x2a   : > { %s795_s10 = smov 128   ;;  %s796_s11 = smov 8  }
  0x2b   : > { %582 = dma.hbm_to_vmem [thread:$0]  (!%p884_p11), %s1058_s1, 2048, %s158_s26, [#allocation6], %s795_s10, %s795_s10, %s796_s11  }
  0x2c   : > { %p34_p1 = scmp.ge.s32.totalorder %s32_s28, 2  ;;  %s39_s25 = sadd.s32 1, %s780_s14 }
  0x2d   : > { %p46_p2 = scmp.ne.s32.totalorder %s780_s14, %s776_s13  ;;  %p47_p4 = scmp.eq.s32.totalorder %s792_s17, 0 }
  0x2e   : > { %s1086_s28 = smov (%p34_p1, %s32_s28), 0  ;;  %p1072_p8 = scmp.ne.s32.totalorder %s1066_s21, 0 }
  0x2f   : > { %p914_p6 = por %p47_p4, %p46_p2  ;;  %s36_s30 = ssub.s32 %s788_s16, %s1086_s28 }
  0x30   : > { %p920_p10 = por %p1072_p8, %p46_p2  ;;  %p592_p12 = scmp.lt.s32.totalorder %s792_s17, 2 }
  0x31   : > { %p37_p11 = scmp.eq.s32.totalorder %s36_s30, 0  ;;  %s177_s26 = sand.u32 1, %s780_s14  }
  0x32   : > { %s471_s4 = sshll.u32 %s177_s26, 4  ;;  %s484_s6 = sshll.u32 %s788_s16, 8 }
  0x33   : > { %s929_s5 = scalar_select %p37_p11, %s780_s14, %s39_s25  }
  0x34   : > { %s935_s9 = scalar_lea.hbm %s1057_s0, %s484_s6  ;;  %s181_s21 = scalar_lea.vmem [#allocation2], %s471_s4 }
  0x35   : > { %s188_s18 = sshll.u32 %s181_s21, 4  ;;  %p941_p13 = pnand %p592_p12, %p914_p6  ;;  %s937_s18 = int_to_ptr.vmem [resolvable:$true] %s188_s18 }
  0x36   : > { %s945_s25 = scalar_lea.sflag [#allocation3], %s177_s26  ;;  %s676_s30 = scalar_lea.hbm %s935_s9, 256 }
  0x37   : > { %p677_p0 = scmp.ne.s32.totalorder %s935_s9, %s676_s30  ;;  %p678_p3 = pneg %p941_p13 }
  0x38   : > { %s681_s29 = scalar_lea.hbm %s1057_s0, 512  ;;  %p682_p9 = scmp.lt.u32.totalorder %s935_s9, %s1057_s0 }
  0x39   : > { %p679_p5 = pnand %p678_p3, %p677_p0  ;;  %p683_p1 = scmp.lt.u32.totalorder %s681_s29, %s676_s30 }
  0x3a   : > { %p685_p4 = scmp.lt.u32.totalorder %s676_s30, %s935_s9 }
  0x3b   : > { %p680_p7 = pneg %p679_p5  ;;  %p684_p2 = por %p683_p1, %p682_p9 }
  0x3d   : > { %p686_p6 = por %p685_p4, %p684_p2 }
  0x3f   : > { %p687_p8 = pnand %p686_p6, %p680_p7 }
  0x41   : > { %690 = shalt.err (!%p687_p8)
}
  0x42   : > { %s691_s26 = scalar_lea.vmem %s937_s18, 256  ;;  %s797_s21 = smov [#allocation2]  }
  0x43   : > { %p692_p12 = scmp.ne.s32.totalorder %s937_s18, %s691_s26  ;;  %s696_s4 = sshll.u32 %s797_s21, 4  ;;  %s697_s4 = int_to_ptr.vmem [resolvable:$false] %s696_s4 }
  0x44   : > { %s698_s6 = scalar_lea.vmem %s697_s4, 512  ;;  %p699_p5 = scmp.lt.s32.totalorder %s937_s18, %s697_s4 }
  0x45   : > { %p694_p11 = pnand %p692_p12, %p678_p3  ;;  %p700_p9 = scmp.lt.s32.totalorder %s698_s6, %s691_s26 }
  0x47   : > { %p695_p0 = pneg %p694_p11  ;;  %p701_p1 = por %p700_p9, %p699_p5 }
  0x49   : > { %p702_p2 = pnand %p701_p1, %p695_p0 }
  0x4b   : > { %705 = shalt.err (!%p702_p2)
}
  0x4c   : > { %586 = dma.hbm_to_vmem [thread:$0]  (!%p941_p13), %s935_s9, 256, %s937_s18, %s945_s25, %s795_s10, %s795_s10, %s796_s11  }
  0x4d   : > { %p1075_p3 = scmp.ne.s32.totalorder %s1069_s24, 0 }
  0x4e   : > { %s979_s30 = sand.u32 (!%p1075_p3), 1, %s776_s13   ;;  %p1076_p7 = scmp.ne.s32.totalorder (!%p1075_p3), %s1067_s22, 0 }
  0x4f   : > { %200 = sbr.rel (%p1075_p3) target bundleno = 355 (0x163), region = 32  ;;  %s475_s29 = sshll.u32 (!%p1075_p3), %s979_s30, 4 }
  0x50   : > { %s203_s7 = scalar_lea.sflag (!%p1075_p3), [#allocation3], %s979_s30  ;;  %s985_s19 = scalar_lea.vmem (!%p1075_p3), [#allocation2], %s475_s29 }
  0x56   : > { %759 = dma.done.wait (%p1076_p7), %s203_s7, 256  }
  0x57   : > { %761 = vsyncadd (%p1076_p7), %s203_s7, 4294967040  ;;  %p1077_p13 = scmp.ne.s32.totalorder %s1065_s20, 0 }
  0x59   : > { %763 = dma.done.wait (%p1077_p13), [#allocation6], 2048  }
  0x5a   : > { %765 = vsyncadd (%p1077_p13), [#allocation6], 4294965248  ;;  %v243_v0 = vld [vmem:[#allocation5] sm:$0xff]  ;;  %v244_v1 = vld [vmem:[#allocation5 + $0x8] sm:$0xff]  ;;  %s235_s20 = scalar_lea.vmem [#allocation7], %s475_s29  ;;  %s485_s11 = sshll.u32 %s784_s15, 8 }
  0x5b   : > { %v245_v2 = vld [vmem:[#allocation5 + $0x10] sm:$0xff]  ;;  %v539_v3 = vpack.c.bf16 %v244_v1, %v243_v0  ;;  %v246_v4 = vld [vmem:[#allocation5 + $0x18] sm:$0xff]  ;;  %v247_v6 = vld [vmem:[#allocation5 + $0x20] sm:$0xff]  ;;  %s358_s22 = sshll.u32 %s235_s20, 4  ;;  %s1008_s25 = scalar_lea.hbm %s1060_s3, %s485_s11  ;;  %s1003_s22 = int_to_ptr.vmem [resolvable:$true] %s358_s22 }
  0x5c   : > { %v543_v5 = vpack.c.bf16 %v246_v4, %v245_v2  ;;  %v248_v7 = vld [vmem:[#allocation5 + $0x28] sm:$0xff]  ;;  %v241_v9 = vld [vmem:[%s985_s19] sm:$0xff]  ;;  %v250_v11 = vld [vmem:[#allocation5 + $0x38] sm:$0xff]  ;;  %s344_s8 = scalar_lea.sflag [#allocation4], %s979_s30  ;;  %s706_s26 = scalar_lea.vmem %s1003_s22, 256 }
  0x5d   : > { %540 = vmatprep.subr.bf16.mxu0 %v539_v3  ;;  %v547_v8 = vpack.c.bf16 %v248_v7, %v247_v6  ;;  %v249_v10 = vld [vmem:[#allocation5 + $0x30] sm:$0xff]  ;;  %536 = vmatprep.mubr.f32.mxu0 %v241_v9  ;;  %v251_v13 = vld [vmem:[#allocation5 + $0x40] sm:$0xff]  ;;  %v252_v14 = vld [vmem:[#allocation5 + $0x48] sm:$0xff]  ;;  %p707_p4 = scmp.ne.s32.totalorder %s1003_s22, %s706_s26  ;;  %s798_s15 = smov [#allocation7]  }
  0x5e   : > { %542 = vmatpush3.bf16.msra.mxu0 %v539_v3  ;;  %v551_v12 = vpack.c.bf16 %v250_v11, %v249_v10  ;;  %v555_v15 = vpack.c.bf16 %v252_v14, %v251_v13  ;;  %v253_v16 = vld [vmem:[#allocation5 + $0x50] sm:$0xff]  ;;  %v254_v17 = vld [vmem:[#allocation5 + $0x58] sm:$0xff]  ;;  %v255_v19 = vld [vmem:[#allocation5 + $0x60] sm:$0xff]  ;;  %s710_s21 = sshll.u32 %s798_s15, 4  ;;  %s711_s21 = int_to_ptr.vmem [resolvable:$false] %s710_s21 }
  0x5f   : > { %544 = vmatprep.subr.bf16.mxu0 %v543_v5  ;;  %v559_v18 = vpack.c.bf16 %v254_v17, %v253_v16  ;;  %v256_v20 = vld [vmem:[#allocation5 + $0x68] sm:$0xff]  ;;  %v257_v22 = vld [vmem:[#allocation5 + $0x70] sm:$0xff]  ;;  %v258_v23 = vld [vmem:[#allocation5 + $0x78] sm:$0xff]  ;;  %p708_p6 = pnand %p707_p4, %p920_p10  ;;  %s712_s4 = scalar_lea.vmem %s711_s21, 512 }
  0x60   : > { %v563_v21 = vpack.c.bf16 %v256_v20, %v255_v19  ;;  %v567_v24 = vpack.c.bf16 %v258_v23, %v257_v22  ;;  %v242_v25 = vld [vmem:[%s985_s19 + $0x8] sm:$0xff]  ;;  %v478_v26 = vld [vmem:[%s1059_s2] ss:$0 sm:$0xff]  ;;  %p713_p12 = scmp.lt.s32.totalorder %s1003_s22, %s711_s21  ;;  %p714_p11 = scmp.lt.s32.totalorder %s712_s4, %s706_s26 }
  0x61   : > { %p709_p8 = pneg %p708_p6 }
  0x62   : > { %546 = vmatpush3.bf16.msra.mxu0 %v543_v5  ;;  %p715_p0 = por %p714_p11, %p713_p12 }
  0x63   : > { %548 = vmatprep.subr.bf16.mxu0 %v547_v8 }
  0x64   : > { %p716_p5 = pnand %p715_p0, %p709_p8 }
  0x66   : > { %550 = vmatpush3.bf16.msra.mxu0 %v547_v8 }
  0x67   : > { %552 = vmatprep.subr.bf16.mxu0 %v551_v12 }
  0x6a   : > { %554 = vmatpush3.bf16.msra.mxu0 %v551_v12 }
  0x6b   : > { %556 = vmatprep.subr.bf16.mxu0 %v555_v15 }
  0x6e   : > { %558 = vmatpush3.bf16.msra.mxu0 %v555_v15 }
  0x6f   : > { %560 = vmatprep.subr.bf16.mxu0 %v559_v18 }
  0x72   : > { %562 = vmatpush3.bf16.msra.mxu0 %v559_v18 }
  0x73   : > { %564 = vmatprep.subr.bf16.mxu0 %v563_v21 }
  0x76   : > { %566 = vmatpush3.bf16.msra.mxu0 %v563_v21 }
  0x77   : > { %568 = vmatprep.subr.bf16.mxu0 %v567_v24 }
  0x7a   : > { %570 = vmatpush3.bf16.msra.mxu0 %v567_v24 }
  0x7d   : > { %537 = vmatmul.mubr.f32.vlgmr.msra.gmra.mrb[0].mxu0 %v242_v25 }
 0x150   : > { %v538_v27 = vpop.f32.mrb[0].mxu0 }
 0x151   : > { %v338_v28 = vadd.f32 %v538_v27, %v478_v26  ;;  %v332_v29 = vpop.f32.mrb[1].mxu0 }
 0x152   : > { %v333_v30 = vadd.f32 %v478_v26, %v332_v29 }
 0x153   : > { %342 = vst [vmem:[%s235_s20 + $0x8] sm:$0xff] %v338_v28 }
 0x154   : > { %341 = vst [vmem:[%s235_s20] sm:$0xff] %v333_v30 }
 0x155   : > { %719 = shalt.err (!%p716_p5)
}
 0x156   : > { %s720_s6 = scalar_lea.hbm %s1008_s25, 256  ;;  %s724_s19 = scalar_lea.hbm %s1060_s3, 512 }
 0x157   : > { %p721_p9 = scmp.ne.s32.totalorder %s1008_s25, %s720_s6  ;;  %p725_p3 = scmp.lt.u32.totalorder %s1008_s25, %s1060_s3 }
 0x158   : > { %p726_p7 = scmp.lt.u32.totalorder %s724_s19, %s720_s6  ;;  %p728_p4 = scmp.lt.u32.totalorder %s720_s6, %s1008_s25 }
 0x159   : > { %p722_p1 = pnand %p721_p9, %p920_p10 }
 0x15a   : > { %p727_p13 = por %p726_p7, %p725_p3 }
 0x15b   : > { %p723_p2 = pneg %p722_p1 }
 0x15c   : > { %p729_p6 = por %p728_p4, %p727_p13 }
 0x15e   : > { %p730_p8 = pnand %p729_p6, %p723_p2 }
 0x160   : > { %733 = shalt.err (!%p730_p8)
}
 0x161   : > { %s799_s10 = smov 128   ;;  %s800_s11 = smov 8  }
 0x162   : > { %577 = dma.vmem_to_hbm [thread:$0]  (%p920_p10), %s1003_s22, 256, %s1008_s25, %s344_s8, %s799_s10, %s799_s10, %s800_s11  }
 0x163 PF: > { %s373_s9 = sand.u32 1, %s772_s12   ;;  %p1078_p12 = scmp.ne.s32.totalorder %s1068_s23, 0 }
 0x164   : > { %p1079_p11 = scmp.ge.s32.totalorder %s792_s17, 2  ;;  %s374_s18 = scalar_lea.sflag [#allocation4], %s373_s9 }
 0x166   : > { %p588_p0 = pnand %p1079_p11, %p1078_p12 }
 0x168   : > { %767 = dma.done.wait (!%p588_p0), %s374_s18, 256  }
 0x169   : > { %769 = vsyncadd (!%p588_p0), %s374_s18, 4294967040  ;;  %s20_s17 = sadd.s32 1, %s792_s17   ;;  %s1080_s12 = smov %s776_s13 }
 0x16a   : > { %p17_p5 = scmp.ge.s32.totalorder %s20_s17, 4   ;;  %s1081_s13 = smov %s780_s14 }
 0x16b   : > { %s1082_s14 = smov %s929_s5  ;;  %s1083_s15 = smov %s788_s16 }
 0x16c   : > { %s1084_s16 = smov %s1086_s28  ;;  %19 = sbr.rel (!%p17_p5) target bundleno = 7 (0x7), region = 85 }
 0x173   :  { %379 = vsyncpa [#allocation3], 1 }
 0x174   :  { %381 = vsyncpa [#allocation3 + $0x1], 1 }
 0x175   :  { %382 = vsyncpa [#allocation6], 1 }
 0x176   :  { %383 = vsyncpa [#allocation4], 1 }
 0x177   :  { %385 = vsyncpa [#allocation4 + $0x1], 1 }

</bundles_post_ra>
